<compile_context>
chip_gen: v5e
topology: v5e:2x2
jax: 0.10.0
libtpu: 0.0.40
codegen_flags: <defaults>
</compile_context>

<pallas_src>
import functools

import jax
import jax.numpy as jnp
from jax.experimental import pallas as pl
from jax.experimental.pallas import tpu as pltpu

NEG_SLOPE = 0.01  # nn.LeakyReLU() default
HIDDEN = 256


def _leaky_relu(z):
    # slope in (0, 1) => max(z, a*z) == leaky_relu(z); single VPU max after the mul.
    return jnp.maximum(z, NEG_SLOPE * z)


# ---------------------------------------------------------------------------
# Kernel: one batch tile of the whole fused forward pass.
#   x_ref    [TB, D]            f32 input tile
#   w1_ref   [D, 512]           fused layer-1 weight  (adv cols 0:256 | val cols 256:512)
#   b1_ref   [1, 512]           fused layer-1 bias
#   wmid_ref [4, 256, 256]      stacked hidden weights: [adv fc1, adv fc2, val fc1, val fc2]
#   bmid_ref [4, 1, 256]        stacked hidden biases (same order)
#   wq_ref   [2, 256, BAY_S]    folded dueling-combine weights: [adv branch, val branch]
#   bq_ref   [1, BAY_S]         folded dueling-combine bias
#   q_ref    [TB, BAY_S]        output tile
# ---------------------------------------------------------------------------
def dueling_dqn_kernel(x_ref, w1_ref, b1_ref, wmid_ref, bmid_ref, wq_ref, bq_ref, q_ref):
    w_dt = w1_ref.dtype  # f32 or bf16; matmuls always accumulate in f32
    x = x_ref[...].astype(w_dt)  # s.float() (and optional bf16 cast for the MXU)

    # Fused first layer of both heads: one wide matmul instead of two half-width ones.
    h1 = _leaky_relu(
        jnp.dot(x, w1_ref[...], preferred_element_type=jnp.float32) + b1_ref[...]
    )  # [TB, 512] f32

    def hidden(h, idx):
        z = jnp.dot(h.astype(w_dt), wmid_ref[idx],
                    preferred_element_type=jnp.float32) + bmid_ref[idx]
        return _leaky_relu(z)  # f32

    # Lane-aligned slices of h1 (256 = 2*128 lanes) -> no tile-crossing relayout.
    ha = hidden(h1[:, :HIDDEN], 0)   # adv hidden 2
    ha = hidden(ha, 1)               # adv hidden 3
    hv = hidden(h1[:, HIDDEN:], 2)   # val hidden 2
    hv = hidden(hv, 3)               # val hidden 3

    # Dueling combine folded into the last-layer weights (host-side algebra):
    #   Q = ha @ Wq_adv + hv @ Wq_val + bq  ==  val + adv - adv.mean(1, keepdim=True)
    qa = jnp.dot(ha.astype(w_dt), wq_ref[0], preferred_element_type=jnp.float32)
    qv = jnp.dot(hv.astype(w_dt), wq_ref[1], preferred_element_type=jnp.float32)
    q_ref[...] = (qa + qv + bq_ref[...]).astype(q_ref.dtype)


# ---------------------------------------------------------------------------
# Host-side parameter handling.
# ---------------------------------------------------------------------------
def init_linear(key, fan_in, fan_out):
    """PyTorch nn.Linear default init: U(-1/sqrt(fan_in), 1/sqrt(fan_in))."""
    kw, kb = jax.random.split(key)
    bound = 1.0 / jnp.sqrt(jnp.float32(fan_in))
    w = jax.random.uniform(kw, (fan_in, fan_out), jnp.float32, -bound, bound)
    b = jax.random.uniform(kb, (1, fan_out), jnp.float32, -bound, bound)
    return w, b


def make_params(key, bay_s, bay_t, hidden=(HIDDEN, HIDDEN, HIDDEN)):
    """16 arrays: adv(W1,b1..W4,b4) then val(W1,b1..W4,b4), all f32, [in,out] layout."""
    d_in = bay_s * bay_t + 1
    params = []
    for out_dim in (bay_s, 1):  # adv head, then val head
        dims = [d_in, *hidden, out_dim]
        for i in range(len(dims) - 1):
            key, sub = jax.random.split(key)
            w, b = init_linear(sub, dims[i], dims[i + 1])
            params.extend([w, b])
    return params


def fuse_params(params, weight_dtype=jnp.float32):
    """Precompute the fused/folded parameter set used by the kernel (pure algebra)."""
    (aw1, ab1, aw2, ab2, aw3, ab3, aw4, ab4,
     vw1, vb1, vw2, vb2, vw3, vb3, vw4, vb4) = params
    bay_s = aw4.shape[1]

    # Fused first layer (shared input x for both heads).
    w1f = jnp.concatenate([aw1, vw1], axis=1)              # [D, 512]
    b1f = jnp.concatenate([ab1, vb1], axis=1)              # [1, 512]

    # Stacked hidden layers.
    w_mid = jnp.stack([aw2, aw3, vw2, vw3], axis=0)        # [4, 256, 256]
    b_mid = jnp.stack([ab2, ab3, vb2, vb3], axis=0)        # [4, 1, 256]

    # Fold  Q = val + adv - adv.mean(1)  into the last-layer weights:
    #   Q = ha @ (aw4 - mean_cols(aw4)) + hv @ tile(vw4, BAY_S) + (ab4 - mean(ab4) + vb4)
    aw4c = aw4 - jnp.mean(aw4, axis=1, keepdims=True)      # [256, BAY_S]
    vw4b = jnp.tile(vw4, (1, bay_s))                       # [256, BAY_S]
    wq = jnp.stack([aw4c, vw4b], axis=0)                   # [2, 256, BAY_S]
    bq = ab4 - jnp.mean(ab4, axis=1, keepdims=True) + vb4  # [1, BAY_S]

    cast = lambda w: w.astype(weight_dtype)
    return (cast(w1f), b1f.astype(jnp.float32),
            cast(w_mid), b_mid.astype(jnp.float32),
            cast(wq), bq.astype(jnp.float32))


# ---------------------------------------------------------------------------
# Wrapper: batch-tiled pallas_call (weights VMEM-resident, batch axis parallel).
# Default TB=512 keeps the double-buffered working set well under the scoped-VMEM
# default on v5e/v6e/v7x; pick a smaller tile_b explicitly if needed.
# ---------------------------------------------------------------------------
@functools.partial(jax.jit, static_argnames=("tile_b",))
def dueling_dqn_forward(s, fused, *, tile_b=512):
    w1f, b1f, w_mid, b_mid, wq, bq = fused
    b_in, d = s.shape
    bay_s = wq.shape[2]
    x = s.astype(jnp.float32)

    if b_in <= tile_b:
        tb, bp = b_in, b_in              # single tile == full extent (any B allowed)
    else:
        assert tile_b % 8 == 0, "batch tile must be a multiple of 8"
        tb = tile_b
        bp = -(-b_in // tb) * tb
        if bp != b_in:                   # pad ragged final tile; sliced off below
            x = jnp.pad(x, ((0, bp - b_in), (0, 0)))

    const2 = lambda i: (0, 0)
    const3 = lambda i: (0, 0, 0)

    out = pl.pallas_call(
        dueling_dqn_kernel,
        out_shape=jax.ShapeDtypeStruct((bp, bay_s), jnp.float32),
        grid_spec=pltpu.PrefetchScalarGridSpec(
            num_scalar_prefetch=0,
            grid=(bp // tb,),
            in_specs=[
                pl.BlockSpec((tb, d), lambda i: (i, 0)),   # x: tiled over batch
                pl.BlockSpec(w1f.shape, const2),           # weights: resident in VMEM
                pl.BlockSpec(b1f.shape, const2),
                pl.BlockSpec(w_mid.shape, const3),
                pl.BlockSpec(b_mid.shape, const3),
                pl.BlockSpec(wq.shape, const3),
                pl.BlockSpec(bq.shape, const2),
            ],
            out_specs=pl.BlockSpec((tb, bay_s), lambda i: (i, 0)),
        ),
        compiler_params=pltpu.CompilerParams(
            dimension_semantics=("parallel",)),
    )(x, w1f, b1f, w_mid, b_mid, wq, bq)

    return out[:b_in] if bp != b_in else out


# ---------------------------------------------------------------------------
# Pure-JAX reference (mirrors the PyTorch module structure, unfused).
# ---------------------------------------------------------------------------
def reference_forward(s, params):
    x = s.astype(jnp.float32)

    def mlp(p):
        h = x
        for i in range(0, len(p) - 2, 2):
            h = _leaky_relu(h @ p[i] + p[i + 1])
        return h @ p[-2] + p[-1]

    adv = mlp(params[:8])
    val = mlp(params[8:])
    return val + adv - adv.mean(axis=1, keepdims=True)


if __name__ == "__main__":
    BAY_S, BAY_T = 8, 4
    D = BAY_S * BAY_T + 1
    key = jax.random.PRNGKey(0)
    key, pkey, skey, skey2 = jax.random.split(key, 4)

    params = make_params(pkey, BAY_S, BAY_T)
    fused_f32 = fuse_params(params, jnp.float32)

    # Small batch (single tile, block == full extent).
    s = jax.random.normal(skey, (4, D), jnp.float32)
    q = dueling_dqn_forward(s, fused_f32)
    jax.block_until_ready(q)
    q_ref = reference_forward(s, params)
    assert q.shape == (4, BAY_S)
    # Tolerance accounts for TPU matmul precision + the different (fused) op ordering.
    assert jnp.allclose(q, q_ref, atol=2e-3, rtol=2e-3), "f32 small-batch mismatch"

    # Larger batch: exercises the batch grid, ragged-tile padding, and pipelining.
    s_big = jax.random.normal(skey2, (600, D), jnp.float32)
    q_big = dueling_dqn_forward(s_big, fused_f32, tile_b=256)
    jax.block_until_ready(q_big)
    q_big_ref = reference_forward(s_big, params)
    assert q_big.shape == (600, BAY_S)
    assert jnp.allclose(q_big, q_big_ref, atol=2e-3, rtol=2e-3), "f32 big-batch mismatch"

    # bf16 weights (half the HBM weight bytes; MXU accumulates in f32, elementwise stays f32).
    fused_bf16 = fuse_params(params, jnp.bfloat16)
    q_bf16 = dueling_dqn_forward(s_big, fused_bf16, tile_b=256)
    jax.block_until_ready(q_bf16)
    assert jnp.allclose(q_bf16, q_big_ref, atol=5e-2, rtol=5e-2), "bf16 mismatch"

    print("KERNEL_OK")
</pallas_src>

<mosaic_0001>
module attributes {stable_mosaic.version = 11 : i64} {
  func.func @dueling_dqn_kernel(%arg0: i32, %arg1: memref<4x33xf32, #tpu.memory_space<vmem>>, %arg2: memref<33x512xf32, #tpu.memory_space<vmem>>, %arg3: memref<1x512xf32, #tpu.memory_space<vmem>>, %arg4: memref<4x256x256xf32, #tpu.memory_space<vmem>>, %arg5: memref<4x1x256xf32, #tpu.memory_space<vmem>>, %arg6: memref<2x256x8xf32, #tpu.memory_space<vmem>>, %arg7: memref<1x8xf32, #tpu.memory_space<vmem>>, %arg8: memref<4x8xf32, #tpu.memory_space<vmem>>) attributes {dimension_semantics = [#tpu.dimension_semantics<parallel>], iteration_bounds = array<i64: 1>, scalar_prefetch = 0 : i64, scratch_operands = 0 : i64, tpu.core_type = #tpu.core_type<tc>, window_params = [{transform_indices = @transform_0, window_bounds = array<i64: 4, 33>}, {pipeline_mode = #tpu.pipeline_mode<synchronous>, transform_indices = @transform_1, window_bounds = array<i64: 33, 512>}, {pipeline_mode = #tpu.pipeline_mode<synchronous>, transform_indices = @transform_2, window_bounds = array<i64: 1, 512>}, {pipeline_mode = #tpu.pipeline_mode<synchronous>, transform_indices = @transform_3, window_bounds = array<i64: 4, 256, 256>}, {pipeline_mode = #tpu.pipeline_mode<synchronous>, transform_indices = @transform_4, window_bounds = array<i64: 4, 1, 256>}, {pipeline_mode = #tpu.pipeline_mode<synchronous>, transform_indices = @transform_5, window_bounds = array<i64: 2, 256, 8>}, {pipeline_mode = #tpu.pipeline_mode<synchronous>, transform_indices = @transform_6, window_bounds = array<i64: 1, 8>}, {transform_indices = @transform_7, window_bounds = array<i64: 4, 8>}]} {
    %c0 = arith.constant 0 : index
    %c0_0 = arith.constant 0 : index
    %0 = vector.load %arg1[%c0, %c0_0] : memref<4x33xf32, #tpu.memory_space<vmem>>, vector<4x33xf32>
    %c0_1 = arith.constant 0 : index
    %c0_2 = arith.constant 0 : index
    %1 = vector.load %arg2[%c0_1, %c0_2] : memref<33x512xf32, #tpu.memory_space<vmem>>, vector<33x512xf32>
    %cst = arith.constant dense<0.000000e+00> : vector<4x512xf32>
    %2 = tpu.matmul %0, %1, %cst {dimension_numbers = #tpu.dot_dimension_numbers<[1], [0], [0], [1], [0, 0, 1, 1], [], []>} : vector<4x33xf32>, vector<33x512xf32>, vector<4x512xf32> -> vector<4x512xf32>
    %c0_3 = arith.constant 0 : index
    %c0_4 = arith.constant 0 : index
    %3 = vector.load %arg3[%c0_3, %c0_4] : memref<1x512xf32, #tpu.memory_space<vmem>>, vector<1x512xf32>
    %4 = vector.broadcast %3 : vector<1x512xf32> to vector<4x512xf32>
    %5 = arith.addf %2, %4 : vector<4x512xf32>
    %cst_5 = arith.constant 0.00999999977 : f32
    %6 = vector.broadcast %cst_5 : f32 to vector<4x512xf32>
    %7 = arith.mulf %6, %5 : vector<4x512xf32>
    %8 = arith.maximumf %5, %7 : vector<4x512xf32>
    %9 = vector.extract_strided_slice %8 {offsets = [0, 0], sizes = [4, 256], strides = [1, 1]} : vector<4x512xf32> to vector<4x256xf32>
    %c0_6 = arith.constant 0 : index
    %c0_7 = arith.constant 0 : index
    %c0_8 = arith.constant 0 : index
    %10 = vector.load %arg4[%c0_6, %c0_7, %c0_8] : memref<4x256x256xf32, #tpu.memory_space<vmem>>, vector<1x256x256xf32>
    %11 = vector.shape_cast %10 : vector<1x256x256xf32> to vector<256x256xf32>
    %cst_9 = arith.constant dense<0.000000e+00> : vector<4x256xf32>
    %12 = tpu.matmul %9, %11, %cst_9 {dimension_numbers = #tpu.dot_dimension_numbers<[1], [0], [0], [1], [0, 0, 1, 1], [], []>} : vector<4x256xf32>, vector<256x256xf32>, vector<4x256xf32> -> vector<4x256xf32>
    %c0_10 = arith.constant 0 : index
    %c0_11 = arith.constant 0 : index
    %c0_12 = arith.constant 0 : index
    %13 = vector.load %arg5[%c0_10, %c0_11, %c0_12] : memref<4x1x256xf32, #tpu.memory_space<vmem>>, vector<1x1x256xf32>
    %14 = vector.shape_cast %13 : vector<1x1x256xf32> to vector<1x256xf32>
    %15 = vector.broadcast %14 : vector<1x256xf32> to vector<4x256xf32>
    %16 = arith.addf %12, %15 : vector<4x256xf32>
    %cst_13 = arith.constant 0.00999999977 : f32
    %17 = vector.broadcast %cst_13 : f32 to vector<4x256xf32>
    %18 = arith.mulf %17, %16 : vector<4x256xf32>
    %19 = arith.maximumf %16, %18 : vector<4x256xf32>
    %c1 = arith.constant 1 : index
    %c0_14 = arith.constant 0 : index
    %c0_15 = arith.constant 0 : index
    %20 = vector.load %arg4[%c1, %c0_14, %c0_15] : memref<4x256x256xf32, #tpu.memory_space<vmem>>, vector<1x256x256xf32>
    %21 = vector.shape_cast %20 : vector<1x256x256xf32> to vector<256x256xf32>
    %cst_16 = arith.constant dense<0.000000e+00> : vector<4x256xf32>
    %22 = tpu.matmul %19, %21, %cst_16 {dimension_numbers = #tpu.dot_dimension_numbers<[1], [0], [0], [1], [0, 0, 1, 1], [], []>} : vector<4x256xf32>, vector<256x256xf32>, vector<4x256xf32> -> vector<4x256xf32>
    %c1_17 = arith.constant 1 : index
    %c0_18 = arith.constant 0 : index
    %c0_19 = arith.constant 0 : index
    %23 = vector.load %arg5[%c1_17, %c0_18, %c0_19] : memref<4x1x256xf32, #tpu.memory_space<vmem>>, vector<1x1x256xf32>
    %24 = vector.shape_cast %23 : vector<1x1x256xf32> to vector<1x256xf32>
    %25 = vector.broadcast %24 : vector<1x256xf32> to vector<4x256xf32>
    %26 = arith.addf %22, %25 : vector<4x256xf32>
    %cst_20 = arith.constant 0.00999999977 : f32
    %27 = vector.broadcast %cst_20 : f32 to vector<4x256xf32>
    %28 = arith.mulf %27, %26 : vector<4x256xf32>
    %29 = arith.maximumf %26, %28 : vector<4x256xf32>
    %30 = vector.extract_strided_slice %8 {offsets = [0, 256], sizes = [4, 256], strides = [1, 1]} : vector<4x512xf32> to vector<4x256xf32>
    %c2 = arith.constant 2 : index
    %c0_21 = arith.constant 0 : index
    %c0_22 = arith.constant 0 : index
    %31 = vector.load %arg4[%c2, %c0_21, %c0_22] : memref<4x256x256xf32, #tpu.memory_space<vmem>>, vector<1x256x256xf32>
    %32 = vector.shape_cast %31 : vector<1x256x256xf32> to vector<256x256xf32>
    %cst_23 = arith.constant dense<0.000000e+00> : vector<4x256xf32>
    %33 = tpu.matmul %30, %32, %cst_23 {dimension_numbers = #tpu.dot_dimension_numbers<[1], [0], [0], [1], [0, 0, 1, 1], [], []>} : vector<4x256xf32>, vector<256x256xf32>, vector<4x256xf32> -> vector<4x256xf32>
    %c2_24 = arith.constant 2 : index
    %c0_25 = arith.constant 0 : index
    %c0_26 = arith.constant 0 : index
    %34 = vector.load %arg5[%c2_24, %c0_25, %c0_26] : memref<4x1x256xf32, #tpu.memory_space<vmem>>, vector<1x1x256xf32>
    %35 = vector.shape_cast %34 : vector<1x1x256xf32> to vector<1x256xf32>
    %36 = vector.broadcast %35 : vector<1x256xf32> to vector<4x256xf32>
    %37 = arith.addf %33, %36 : vector<4x256xf32>
    %cst_27 = arith.constant 0.00999999977 : f32
    %38 = vector.broadcast %cst_27 : f32 to vector<4x256xf32>
    %39 = arith.mulf %38, %37 : vector<4x256xf32>
    %40 = arith.maximumf %37, %39 : vector<4x256xf32>
    %c3 = arith.constant 3 : index
    %c0_28 = arith.constant 0 : index
    %c0_29 = arith.constant 0 : index
    %41 = vector.load %arg4[%c3, %c0_28, %c0_29] : memref<4x256x256xf32, #tpu.memory_space<vmem>>, vector<1x256x256xf32>
    %42 = vector.shape_cast %41 : vector<1x256x256xf32> to vector<256x256xf32>
    %cst_30 = arith.constant dense<0.000000e+00> : vector<4x256xf32>
    %43 = tpu.matmul %40, %42, %cst_30 {dimension_numbers = #tpu.dot_dimension_numbers<[1], [0], [0], [1], [0, 0, 1, 1], [], []>} : vector<4x256xf32>, vector<256x256xf32>, vector<4x256xf32> -> vector<4x256xf32>
    %c3_31 = arith.constant 3 : index
    %c0_32 = arith.constant 0 : index
    %c0_33 = arith.constant 0 : index
    %44 = vector.load %arg5[%c3_31, %c0_32, %c0_33] : memref<4x1x256xf32, #tpu.memory_space<vmem>>, vector<1x1x256xf32>
    %45 = vector.shape_cast %44 : vector<1x1x256xf32> to vector<1x256xf32>
    %46 = vector.broadcast %45 : vector<1x256xf32> to vector<4x256xf32>
    %47 = arith.addf %43, %46 : vector<4x256xf32>
    %cst_34 = arith.constant 0.00999999977 : f32
    %48 = vector.broadcast %cst_34 : f32 to vector<4x256xf32>
    %49 = arith.mulf %48, %47 : vector<4x256xf32>
    %50 = arith.maximumf %47, %49 : vector<4x256xf32>
    %c0_35 = arith.constant 0 : index
    %c0_36 = arith.constant 0 : index
    %c0_37 = arith.constant 0 : index
    %51 = vector.load %arg6[%c0_35, %c0_36, %c0_37] : memref<2x256x8xf32, #tpu.memory_space<vmem>>, vector<1x256x8xf32>
    %52 = vector.shape_cast %51 : vector<1x256x8xf32> to vector<256x8xf32>
    %cst_38 = arith.constant dense<0.000000e+00> : vector<4x8xf32>
    %53 = tpu.matmul %29, %52, %cst_38 {dimension_numbers = #tpu.dot_dimension_numbers<[1], [0], [0], [1], [0, 0, 1, 1], [], []>} : vector<4x256xf32>, vector<256x8xf32>, vector<4x8xf32> -> vector<4x8xf32>
    %c1_39 = arith.constant 1 : index
    %c0_40 = arith.constant 0 : index
    %c0_41 = arith.constant 0 : index
    %54 = vector.load %arg6[%c1_39, %c0_40, %c0_41] : memref<2x256x8xf32, #tpu.memory_space<vmem>>, vector<1x256x8xf32>
    %55 = vector.shape_cast %54 : vector<1x256x8xf32> to vector<256x8xf32>
    %cst_42 = arith.constant dense<0.000000e+00> : vector<4x8xf32>
    %56 = tpu.matmul %50, %55, %cst_42 {dimension_numbers = #tpu.dot_dimension_numbers<[1], [0], [0], [1], [0, 0, 1, 1], [], []>} : vector<4x256xf32>, vector<256x8xf32>, vector<4x8xf32> -> vector<4x8xf32>
    %57 = arith.addf %53, %56 : vector<4x8xf32>
    %c0_43 = arith.constant 0 : index
    %c0_44 = arith.constant 0 : index
    %58 = vector.load %arg7[%c0_43, %c0_44] : memref<1x8xf32, #tpu.memory_space<vmem>>, vector<1x8xf32>
    %59 = vector.broadcast %58 : vector<1x8xf32> to vector<4x8xf32>
    %60 = arith.addf %57, %59 : vector<4x8xf32>
    %c0_45 = arith.constant 0 : index
    %c0_46 = arith.constant 0 : index
    %61 = vector.load %arg8[%c0_45, %c0_46] : memref<4x8xf32, #tpu.memory_space<vmem>>, vector<4x8xf32>
    tpu.vector_store %arg8[%c0_45, %c0_46], %60 {strides = array<i32>} : memref<4x8xf32, #tpu.memory_space<vmem>>, vector<4x8xf32>,
    return
  }
  func.func @transform_0(%arg0: i32) -> (i32, i32) {
    %c0_i32 = arith.constant 0 : i32
    %c0_i32_0 = arith.constant 0 : i32
    return %arg0, %c0_i32 : i32, i32
  }
  func.func @transform_1(%arg0: i32) -> (i32, i32) {
    %c0_i32 = arith.constant 0 : i32
    %c0_i32_0 = arith.constant 0 : i32
    %c0_i32_1 = arith.constant 0 : i32
    return %c0_i32, %c0_i32_0 : i32, i32
  }
  func.func @transform_2(%arg0: i32) -> (i32, i32) {
    %c0_i32 = arith.constant 0 : i32
    %c0_i32_0 = arith.constant 0 : i32
    %c0_i32_1 = arith.constant 0 : i32
    return %c0_i32, %c0_i32_0 : i32, i32
  }
  func.func @transform_3(%arg0: i32) -> (i32, i32, i32) {
    %c0_i32 = arith.constant 0 : i32
    %c0_i32_0 = arith.constant 0 : i32
    %c0_i32_1 = arith.constant 0 : i32
    %c0_i32_2 = arith.constant 0 : i32
    return %c0_i32, %c0_i32_0, %c0_i32_1 : i32, i32, i32
  }
  func.func @transform_4(%arg0: i32) -> (i32, i32, i32) {
    %c0_i32 = arith.constant 0 : i32
    %c0_i32_0 = arith.constant 0 : i32
    %c0_i32_1 = arith.constant 0 : i32
    %c0_i32_2 = arith.constant 0 : i32
    return %c0_i32, %c0_i32_0, %c0_i32_1 : i32, i32, i32
  }
  func.func @transform_5(%arg0: i32) -> (i32, i32, i32) {
    %c0_i32 = arith.constant 0 : i32
    %c0_i32_0 = arith.constant 0 : i32
    %c0_i32_1 = arith.constant 0 : i32
    %c0_i32_2 = arith.constant 0 : i32
    return %c0_i32, %c0_i32_0, %c0_i32_1 : i32, i32, i32
  }
  func.func @transform_6(%arg0: i32) -> (i32, i32) {
    %c0_i32 = arith.constant 0 : i32
    %c0_i32_0 = arith.constant 0 : i32
    %c0_i32_1 = arith.constant 0 : i32
    return %c0_i32, %c0_i32_0 : i32, i32
  }
  func.func @transform_7(%arg0: i32) -> (i32, i32) {
    %c0_i32 = arith.constant 0 : i32
    %c0_i32_0 = arith.constant 0 : i32
    return %arg0, %c0_i32 : i32, i32
  }
}

</mosaic_0001>

<bundles_post_ra>
// kernel: dueling_dqn_forward.1
= control target key start
LH: loop header
LB: loop body
LE: loop exit
PB: predicated region body
PF: predicated region fallthrough
CT: control target
= control target key end

     0   :  { %12 = vsyncpa [#allocation3], 0  ;;  %s1413_s0 = inlined_call_operand.vmem [shape: f32[4,33], index: 0, kind: input, shape index: {}]   ;;  %s1414_s1 = inlined_call_operand.vmem [shape: f32[33,512], index: 1, kind: input, shape index: {}]   ;;  %s1415_s2 = inlined_call_operand.vmem [shape: f32[1,512], index: 2, kind: input, shape index: {}]   ;;  %s1416_s3 = inlined_call_operand.hbm [shape: f32[4,256,256], index: 3, kind: input, shape index: {}]   ;;  %s1417_s4 = inlined_call_operand.vmem [shape: f32[4,1,256], index: 4, kind: input, shape index: {}]   ;;  %s1418_s5 = inlined_call_operand.vmem [shape: f32[2,256,8], index: 5, kind: input, shape index: {}]   ;;  %s1419_s6 = inlined_call_operand.vmem [shape: f32[1,8], index: 6, kind: input, shape index: {}]   ;;  %s1420_s7 = inlined_call_operand.hbm [shape: f32[4,8], index: 7, kind: output, shape index: {}]  }
   0x1   :  { %13 = vsyncpa [#allocation4], 0  ;;  %s24_s26 = sshll.u32 %s1416_s3, 4  ;;  %s1070_s27 = smov [#allocation2]   ;;  %s25_s26 = int_to_ptr.hbm [resolvable:$true] %s24_s26 }
   0x2   :  { %s26_s28 = sshll.u32 %s1070_s27, 4  ;;  %s1071_s29 = smov 256   ;;  %s27_s28 = int_to_ptr.vmem [resolvable:$true] %s26_s28 }
   0x3   :  { %s1072_s30 = smov 16  }
   0x4   :  { %32 = dma.hbm_to_vmem [thread:$0]  %s25_s26, 32768, %s27_s28, [#allocation3], %s1071_s29, %s1071_s29, %s1072_s30  }
   0x5   :  { %1066 = dma.done.wait [#allocation3], 32768  }
   0x6   :  { %1067 = vsyncadd [#allocation3], 4294934528  ;;  %vm78_vm0 = vcmask 1040384   ;;  %v60_v0 = vld [vmem:[%s1414_s1 + $0x80] sm:$0x1]  ;;  %v57_v3 = vld [vmem:[%s1414_s1 + $0x68] sm:$0xff] }
   0x7   :  { %v61_v1 = vld [vmem:[%s1414_s1 + $0x88] sm:$0x1]  ;;  %v56_v2 = vld [vmem:[%s1414_s1 + $0x60] sm:$0xff]  ;;  %970 = vmatpush.msk.msra.mxu0 %vm78_vm0, %v60_v0  ;;  %v62_v7 = vld [vmem:[%s1414_s1 + $0x90] sm:$0x1]  ;;  %vm74_vm1 = vcmask 269312  }
   0x8   :  { %972 = vmatpush.msk.msra.mxu1 %vm78_vm0, %v61_v1  ;;  %v52_v4 = vld [vmem:[%s1414_s1 + $0x40] sm:$0xff]  ;;  %v53_v5 = vld [vmem:[%s1414_s1 + $0x48] sm:$0xff]  ;;  %974 = vmatpush.msk.msra.mxu2 %vm78_vm0, %v62_v7  ;;  %v63_v9 = vld [vmem:[%s1414_s1 + $0x98] sm:$0x1]  ;;  %s1073_s25 = smov [#allocation5]   ;;  %s960_s29 = sshll.u32 %s1420_s7, 4  ;;  %s961_s29 = int_to_ptr.hbm [resolvable:$true] %s960_s29 }
   0x9   :  { %103 = vmatpush.msra.mxu0 %v56_v2  ;;  %v48_v6 = vld [vmem:[%s1414_s1 + $0x20] sm:$0xff]  ;;  %v49_v8 = vld [vmem:[%s1414_s1 + $0x28] sm:$0xff]  ;;  %v58_v10 = vld [vmem:[%s1414_s1 + $0x70] sm:$0xff]  ;;  %976 = vmatpush.msk.msra.mxu3 %vm78_vm0, %v63_v9  ;;  %s958_s26 = sshll.u32 %s1073_s25, 4  ;;  %vm951_vm2 = vcmask 60416   ;;  %s959_s26 = int_to_ptr.vmem [resolvable:$true] %s958_s26 }
   0xa   :  { %123 = vmatpush.msra.mxu1 %v57_v3  ;;  %v59_v11 = vld [vmem:[%s1414_s1 + $0x78] sm:$0xff]  ;;  %v54_v12 = vld [vmem:[%s1414_s1 + $0x50] sm:$0xff]  ;;  %v44_v13 = vld [vmem:[%s1414_s1] sm:$0xff]  ;;  %143 = vmatpush.msra.mxu2 %v58_v10 }
   0xb   :  { %104 = vmatpush.msra.mxu0 %v52_v4  ;;  %v45_v14 = vld [vmem:[%s1414_s1 + $0x8] sm:$0xff]  ;;  %v1169_v15 = vld [vmem:[%s1413_s0] sm:$0xf]  ;;  %163 = vmatpush.msra.mxu3 %v59_v11  ;;  %v55_v16 = vld [vmem:[%s1414_s1 + $0x58] sm:$0xff] }
   0xc   :  { %124 = vmatpush.msra.mxu1 %v53_v5  ;;  %144 = vmatpush.msra.mxu2 %v54_v12  ;;  %v50_v17 = vld [vmem:[%s1414_s1 + $0x30] sm:$0xff]  ;;  %v51_v20 = vld [vmem:[%s1414_s1 + $0x38] sm:$0xff]  ;;  %v207_v23 = vld [vmem:[#allocation2 + $0xe0] sm:$0xff] }
   0xd   :  { %105 = vmatpush.msra.mxu0 %v48_v6  ;;  %v209_v18 = vld [vmem:[#allocation2 + $0xf0] sm:$0xff]  ;;  %164 = vmatpush.msra.mxu3 %v55_v16  ;;  %v210_v22 = vld [vmem:[#allocation2 + $0xf8] sm:$0xff]  ;;  %v239_v25 = vld [vmem:[#allocation2 + $0x1e0] sm:$0xff] }
   0xe   :  { %125 = vmatpush.msra.mxu1 %v49_v8  ;;  %v241_v19 = vld [vmem:[#allocation2 + $0x1f0] sm:$0xff]  ;;  %145 = vmatpush.msra.mxu2 %v50_v17  ;;  %v47_v24 = vld [vmem:[%s1414_s1 + $0x18] sm:$0xff]  ;;  %v208_v27 = vld [vmem:[#allocation2 + $0xe8] sm:$0xff] }
   0xf   :  { %106 = vmatpush.msra.mxu0 %v44_v13  ;;  %v46_v21 = vld [vmem:[%s1414_s1 + $0x10] sm:$0xff]  ;;  %165 = vmatpush.msra.mxu3 %v51_v20  ;;  %v242_v26 = vld [vmem:[#allocation2 + $0x1f8] sm:$0xff]  ;;  %v240_v30 = vld [vmem:[#allocation2 + $0x1e8] sm:$0xff] }
  0x10   :  { %126 = vmatpush.msra.mxu1 %v45_v14  ;;  %971 = vmatmul.msk.f32.vlgmr.msra.gmra.mxu0 %vm74_vm1, %v1169_v15  ;;  %v205_v28 = vld [vmem:[#allocation2 + $0xd0] sm:$0xff]  ;;  %v206_v31 = vld [vmem:[#allocation2 + $0xd8] sm:$0xff]  ;;  %v203_v32 = vld [vmem:[#allocation2 + $0xc0] sm:$0xff] }
  0x11   :  { %973 = vmatmul.msk.f32.vlgmr.msra.gmra.mxu1 %vm74_vm1, %v1169_v15  ;;  %249 = vmatpush.msrb.mxu0 %v209_v18  ;;  %v237_v29 = vld [vmem:[#allocation2 + $0x1d0] sm:$0xff]  ;;  %v235_v33 = vld [vmem:[#allocation2 + $0x1c0] sm:$0xff]  ;;  %v238_v34 = vld [vmem:[#allocation2 + $0x1d8] sm:$0xff] }
  0x12   :  { %269 = vmatpush.msrb.mxu1 %v241_v19  ;;  %146 = vmatpush.msra.mxu2 %v46_v21  ;;  %v204_v35 = vld [vmem:[#allocation2 + $0xc8] sm:$0xff]  ;;  %v201_v36 = vld [vmem:[#allocation2 + $0xb0] sm:$0xff]  ;;  %v202_v39 = vld [vmem:[#allocation2 + $0xb8] sm:$0xff] }
  0x13   :  { %250 = vmatpush.msrb.mxu0 %v207_v23  ;;  %166 = vmatpush.msra.mxu3 %v47_v24  ;;  %v233_v37 = vld [vmem:[#allocation2 + $0x1b0] sm:$0xff]  ;;  %v236_v38 = vld [vmem:[#allocation2 + $0x1c8] sm:$0xff]  ;;  %v199_v40 = vld [vmem:[#allocation2 + $0xa0] sm:$0xff] }
  0x14   :  { %289 = vmatpush.msrb.mxu2 %v210_v22  ;;  %270 = vmatpush.msrb.mxu1 %v239_v25  ;;  %v231_v41 = vld [vmem:[#allocation2 + $0x1a0] sm:$0xff]  ;;  %v234_v42 = vld [vmem:[#allocation2 + $0x1b8] sm:$0xff]  ;;  %v200_v43 = vld [vmem:[#allocation2 + $0xa8] sm:$0xff] }
  0x15   :  { %309 = vmatpush.msrb.mxu3 %v242_v26  ;;  %251 = vmatpush.msrb.mxu0 %v205_v28  ;;  %v197_v44 = vld [vmem:[#allocation2 + $0x90] sm:$0xff]  ;;  %v232_v46 = vld [vmem:[#allocation2 + $0x1a8] sm:$0xff]  ;;  %v198_v47 = vld [vmem:[#allocation2 + $0x98] sm:$0xff] }
  0x16   :  { %290 = vmatpush.msrb.mxu2 %v208_v27  ;;  %271 = vmatpush.msrb.mxu1 %v237_v29  ;;  %v229_v45 = vld [vmem:[#allocation2 + $0x190] sm:$0xff]  ;;  %v195_v48 = vld [vmem:[#allocation2 + $0x80] sm:$0xff]  ;;  %v230_v50 = vld [vmem:[#allocation2 + $0x198] sm:$0xff] }
  0x17   :  { %310 = vmatpush.msrb.mxu3 %v240_v30  ;;  %252 = vmatpush.msrb.mxu0 %v203_v32  ;;  %v227_v49 = vld [vmem:[#allocation2 + $0x180] sm:$0xff]  ;;  %v196_v51 = vld [vmem:[#allocation2 + $0x88] sm:$0xff]  ;;  %v193_v52 = vld [vmem:[#allocation2 + $0x70] sm:$0xff] }
  0x18   :  { %291 = vmatpush.msrb.mxu2 %v206_v31  ;;  %272 = vmatpush.msrb.mxu1 %v235_v33  ;;  %v225_v53 = vld [vmem:[#allocation2 + $0x170] sm:$0xff]  ;;  %v228_v54 = vld [vmem:[#allocation2 + $0x188] sm:$0xff]  ;;  %v194_v55 = vld [vmem:[#allocation2 + $0x78] sm:$0xff] }
  0x19   :  { %311 = vmatpush.msrb.mxu3 %v238_v34  ;;  %253 = vmatpush.msrb.mxu0 %v201_v36  ;;  %v191_v56 = vld [vmem:[#allocation2 + $0x60] sm:$0xff]  ;;  %v226_v58 = vld [vmem:[#allocation2 + $0x178] sm:$0xff]  ;;  %v192_v59 = vld [vmem:[#allocation2 + $0x68] sm:$0xff] }
  0x1a   :  { %292 = vmatpush.msrb.mxu2 %v204_v35  ;;  %273 = vmatpush.msrb.mxu1 %v233_v37  ;;  %v223_v57 = vld [vmem:[#allocation2 + $0x160] sm:$0xff]  ;;  %v189_v60 = vld [vmem:[#allocation2 + $0x50] sm:$0xff]  ;;  %v224_v62 = vld [vmem:[#allocation2 + $0x168] sm:$0xff] }
  0x1b   :  { %312 = vmatpush.msrb.mxu3 %v236_v38  ;;  %254 = vmatpush.msrb.mxu0 %v199_v40  ;;  %v221_v61 = vld [vmem:[#allocation2 + $0x150] sm:$0xff]  ;;  %v190_v63 = vld [vmem:[#allocation2 + $0x58] sm:$0xff]  ;;  %v187_v0 = vld [vmem:[#allocation2 + $0x40] sm:$0xff] }
  0x1c   :  { %293 = vmatpush.msrb.mxu2 %v202_v39  ;;  %274 = vmatpush.msrb.mxu1 %v231_v41  ;;  %v222_v1 = vld [vmem:[#allocation2 + $0x158] sm:$0xff]  ;;  %v219_v2 = vld [vmem:[#allocation2 + $0x140] sm:$0xff]  ;;  %v188_v3 = vld [vmem:[#allocation2 + $0x48] sm:$0xff] }
  0x1d   :  { %313 = vmatpush.msrb.mxu3 %v234_v42  ;;  %255 = vmatpush.msrb.mxu0 %v197_v44  ;;  %v220_v4 = vld [vmem:[#allocation2 + $0x148] sm:$0xff]  ;;  %v185_v5 = vld [vmem:[#allocation2 + $0x30] sm:$0xff]  ;;  %v186_v7 = vld [vmem:[#allocation2 + $0x38] sm:$0xff] }
  0x1e   :  { %294 = vmatpush.msrb.mxu2 %v200_v43  ;;  %275 = vmatpush.msrb.mxu1 %v229_v45  ;;  %v217_v6 = vld [vmem:[#allocation2 + $0x130] sm:$0xff]  ;;  %v218_v8 = vld [vmem:[#allocation2 + $0x138] sm:$0xff]  ;;  %v183_v9 = vld [vmem:[#allocation2 + $0x20] sm:$0xff] }
  0x1f   :  { %314 = vmatpush.msrb.mxu3 %v232_v46  ;;  %256 = vmatpush.msrb.mxu0 %v195_v48  ;;  %v215_v10 = vld [vmem:[#allocation2 + $0x120] sm:$0xff]  ;;  %v184_v11 = vld [vmem:[#allocation2 + $0x28] sm:$0xff]  ;;  %v181_v13 = vld [vmem:[#allocation2 + $0x10] sm:$0xff] }
  0x20   :  { %295 = vmatpush.msrb.mxu2 %v198_v47  ;;  %276 = vmatpush.msrb.mxu1 %v227_v49  ;;  %v216_v12 = vld [vmem:[#allocation2 + $0x128] sm:$0xff]  ;;  %v213_v14 = vld [vmem:[#allocation2 + $0x110] sm:$0xff]  ;;  %v214_v16 = vld [vmem:[#allocation2 + $0x118] sm:$0xff] }
  0x21   :  { %315 = vmatpush.msrb.mxu3 %v230_v50  ;;  %257 = vmatpush.msrb.mxu0 %v193_v52  ;;  %v179_v17 = vld [vmem:[#allocation2] sm:$0xff]  ;;  %v180_v19 = vld [vmem:[#allocation2 + $0x8] sm:$0xff]  ;;  %v364_v21 = vld [vmem:[#allocation2 + $0x2f0] sm:$0xff] }
  0x22   :  { %296 = vmatpush.msrb.mxu2 %v196_v51  ;;  %277 = vmatpush.msrb.mxu1 %v225_v53  ;;  %v211_v18 = vld [vmem:[#allocation2 + $0x100] sm:$0xff]  ;;  %v212_v20 = vld [vmem:[#allocation2 + $0x108] sm:$0xff]  ;;  %v365_v22 = vld [vmem:[#allocation2 + $0x2f8] sm:$0xff] }
  0x23   :  { %316 = vmatpush.msrb.mxu3 %v228_v54  ;;  %258 = vmatpush.msrb.mxu0 %v191_v56  ;;  %v362_v23 = vld [vmem:[#allocation2 + $0x2e0] sm:$0xff]  ;;  %v363_v24 = vld [vmem:[#allocation2 + $0x2e8] sm:$0xff]  ;;  %v360_v25 = vld [vmem:[#allocation2 + $0x2d0] sm:$0xff] }
  0x24   :  { %297 = vmatpush.msrb.mxu2 %v194_v55  ;;  %278 = vmatpush.msrb.mxu1 %v223_v57  ;;  %v361_v26 = vld [vmem:[#allocation2 + $0x2d8] sm:$0xff]  ;;  %v396_v27 = vld [vmem:[#allocation2 + $0x3f0] sm:$0xff]  ;;  %v394_v29 = vld [vmem:[#allocation2 + $0x3e0] sm:$0xff] }
  0x25   :  { %317 = vmatpush.msrb.mxu3 %v226_v58  ;;  %259 = vmatpush.msrb.mxu0 %v189_v60  ;;  %v397_v28 = vld [vmem:[#allocation2 + $0x3f8] sm:$0xff]  ;;  %v358_v30 = vld [vmem:[#allocation2 + $0x2c0] sm:$0xff]  ;;  %v359_v31 = vld [vmem:[#allocation2 + $0x2c8] sm:$0xff] }
  0x26   :  { %298 = vmatpush.msrb.mxu2 %v192_v59  ;;  %279 = vmatpush.msrb.mxu1 %v221_v61  ;;  %v395_v32 = vld [vmem:[#allocation2 + $0x3e8] sm:$0xff]  ;;  %v392_v33 = vld [vmem:[#allocation2 + $0x3d0] sm:$0xff]  ;;  %v393_v34 = vld [vmem:[#allocation2 + $0x3d8] sm:$0xff] }
  0x27   :  { %318 = vmatpush.msrb.mxu3 %v224_v62  ;;  %975 = vmatmul.msk.f32.vlgmr.msra.gmra.mxu2 %vm74_vm1, %v1169_v15  ;;  %v356_v35 = vld [vmem:[#allocation2 + $0x2b0] sm:$0xff]  ;;  %v357_v36 = vld [vmem:[#allocation2 + $0x2b8] sm:$0xff]  ;;  %v390_v37 = vld [vmem:[#allocation2 + $0x3c0] sm:$0xff] }
  0x28   :  { %299 = vmatpush.msrb.mxu2 %v190_v63  ;;  %260 = vmatpush.msrb.mxu0 %v187_v0  ;;  %v391_v38 = vld [vmem:[#allocation2 + $0x3c8] sm:$0xff]  ;;  %v354_v39 = vld [vmem:[#allocation2 + $0x2a0] sm:$0xff]  ;;  %v388_v41 = vld [vmem:[#allocation2 + $0x3b0] sm:$0xff] }
  0x29   :  { %319 = vmatpush.msrb.mxu3 %v222_v1  ;;  %280 = vmatpush.msrb.mxu1 %v219_v2  ;;  %v355_v40 = vld [vmem:[#allocation2 + $0x2a8] sm:$0xff]  ;;  %v389_v42 = vld [vmem:[#allocation2 + $0x3b8] sm:$0xff]  ;;  %v352_v43 = vld [vmem:[#allocation2 + $0x290] sm:$0xff] }
  0x2a   :  { %300 = vmatpush.msrb.mxu2 %v188_v3  ;;  %977 = vmatmul.msk.f32.vlgmr.msra.gmra.mxu3 %vm74_vm1, %v1169_v15  ;;  %v182_v15 = vld [vmem:[#allocation2 + $0x18] sm:$0xff]  ;;  %v386_v45 = vld [vmem:[#allocation2 + $0x3a0] sm:$0xff]  ;;  %v387_v46 = vld [vmem:[#allocation2 + $0x3a8] sm:$0xff] }
  0x2b   :  { %320 = vmatpush.msrb.mxu3 %v220_v4  ;;  %261 = vmatpush.msrb.mxu0 %v185_v5  ;;  %v353_v44 = vld [vmem:[#allocation2 + $0x298] sm:$0xff]  ;;  %v350_v47 = vld [vmem:[#allocation2 + $0x280] sm:$0xff]  ;;  %v351_v48 = vld [vmem:[#allocation2 + $0x288] sm:$0xff] }
  0x2c   :  { %281 = vmatpush.msrb.mxu1 %v217_v6  ;;  %301 = vmatpush.msrb.mxu2 %v186_v7  ;;  %v384_v49 = vld [vmem:[#allocation2 + $0x390] sm:$0xff]  ;;  %v385_v50 = vld [vmem:[#allocation2 + $0x398] sm:$0xff]  ;;  %v382_v53 = vld [vmem:[#allocation2 + $0x380] sm:$0xff] }
  0x2d   :  { %321 = vmatpush.msrb.mxu3 %v218_v8  ;;  %262 = vmatpush.msrb.mxu0 %v183_v9  ;;  %v348_v51 = vld [vmem:[#allocation2 + $0x270] sm:$0xff]  ;;  %v349_v52 = vld [vmem:[#allocation2 + $0x278] sm:$0xff]  ;;  %v383_v54 = vld [vmem:[#allocation2 + $0x388] sm:$0xff] }
  0x2e   :  { %282 = vmatpush.msrb.mxu1 %v215_v10  ;;  %302 = vmatpush.msrb.mxu2 %v184_v11  ;;  %v346_v55 = vld [vmem:[#allocation2 + $0x260] sm:$0xff]  ;;  %v347_v56 = vld [vmem:[#allocation2 + $0x268] sm:$0xff]  ;;  %v380_v57 = vld [vmem:[#allocation2 + $0x370] sm:$0xff] }
  0x2f   :  { %322 = vmatpush.msrb.mxu3 %v216_v12  ;;  %263 = vmatpush.msrb.mxu0 %v181_v13  ;;  %v381_v58 = vld [vmem:[#allocation2 + $0x378] sm:$0xff]  ;;  %v1197_v59 = vld [vmem:[%s1415_s2] sm:$0xf]  ;;  %v344_v60 = vld [vmem:[#allocation2 + $0x250] sm:$0xff] }
  0x30   :  { %283 = vmatpush.msrb.mxu1 %v213_v14  ;;  %303 = vmatpush.msrb.mxu2 %v182_v15  ;;  %v345_v61 = vld [vmem:[#allocation2 + $0x258] sm:$0xff]  ;;  %v378_v62 = vld [vmem:[#allocation2 + $0x360] sm:$0xff]  ;;  %v379_v63 = vld [vmem:[#allocation2 + $0x368] sm:$0xff]  ;;  %v66_v2 = vperm.slane %v1197_v59, 0  ;;  %v67_v3 = vperm.slane %v1197_v59, 1 }
  0x31   :  { %323 = vmatpush.msrb.mxu3 %v214_v16  ;;  %264 = vmatpush.msrb.mxu0 %v179_v17  ;;  %v342_v0 = vld [vmem:[#allocation2 + $0x240] sm:$0xff]  ;;  %v343_v1 = vld [vmem:[#allocation2 + $0x248] sm:$0xff]  ;;  %v376_v4 = vld [vmem:[#allocation2 + $0x350] sm:$0xff] }
  0x32   :  { %284 = vmatpush.msrb.mxu1 %v211_v18  ;;  %304 = vmatpush.msrb.mxu2 %v180_v19  ;;  %v377_v5 = vld [vmem:[#allocation2 + $0x358] sm:$0xff]  ;;  %v340_v6 = vld [vmem:[#allocation2 + $0x230] sm:$0xff]  ;;  %v374_v8 = vld [vmem:[#allocation2 + $0x340] sm:$0xff] }
  0x33   :  { %324 = vmatpush.msrb.mxu3 %v212_v20  ;;  %405 = vmatpush.msra.mxu0 %v364_v21  ;;  %v341_v7 = vld [vmem:[#allocation2 + $0x238] sm:$0xff]  ;;  %v375_v9 = vld [vmem:[#allocation2 + $0x348] sm:$0xff]  ;;  %v338_v12 = vld [vmem:[#allocation2 + $0x220] sm:$0xff] }
  0x34   :  { %445 = vmatpush.msra.mxu2 %v365_v22  ;;  %425 = vmatpush.msra.mxu1 %v396_v27  ;;  %v339_v13 = vld [vmem:[#allocation2 + $0x228] sm:$0xff]  ;;  %v372_v16 = vld [vmem:[#allocation2 + $0x330] sm:$0xff]  ;;  %v373_v17 = vld [vmem:[#allocation2 + $0x338] sm:$0xff] }
  0x35   :  { %406 = vmatpush.msra.mxu0 %v362_v23  ;;  %465 = vmatpush.msra.mxu3 %v397_v28  ;;  %v336_v18 = vld [vmem:[#allocation2 + $0x210] sm:$0xff]  ;;  %v337_v19 = vld [vmem:[#allocation2 + $0x218] sm:$0xff]  ;;  %v370_v22 = vld [vmem:[#allocation2 + $0x320] sm:$0xff] }
  0x36   :  { %446 = vmatpush.msra.mxu2 %v363_v24  ;;  %426 = vmatpush.msra.mxu1 %v394_v29  ;;  %v371_v23 = vld [vmem:[#allocation2 + $0x328] sm:$0xff]  ;;  %v520_v28 = vld [vmem:[#allocation2 + $0x4f0] sm:$0xff]  ;;  %v521_v29 = vld [vmem:[#allocation2 + $0x4f8] sm:$0xff] }
  0x37   :  { %407 = vmatpush.msra.mxu0 %v360_v25  ;;  %466 = vmatpush.msra.mxu3 %v395_v32  ;;  %v335_v27 = vld [vmem:[#allocation2 + $0x208] sm:$0xff]  ;;  %v518_v32 = vld [vmem:[#allocation2 + $0x4e0] sm:$0xff] }
  0x38   :  { %447 = vmatpush.msra.mxu2 %v361_v26  ;;  %427 = vmatpush.msra.mxu1 %v392_v33  ;;  %v334_v26 = vld [vmem:[#allocation2 + $0x200] sm:$0xff]  ;;  %v519_v33 = vld [vmem:[#allocation2 + $0x4e8] sm:$0xff] }
  0x39   :  { %408 = vmatpush.msra.mxu0 %v358_v30  ;;  %467 = vmatpush.msra.mxu3 %v393_v34  ;;  %v368_v30 = vld [vmem:[#allocation2 + $0x310] sm:$0xff]  ;;  %v366_v34 = vld [vmem:[#allocation2 + $0x300] sm:$0xff] }
  0x3a   :  { %448 = vmatpush.msra.mxu2 %v359_v31  ;;  %428 = vmatpush.msra.mxu1 %v390_v37  ;;  %v369_v31 = vld [vmem:[#allocation2 + $0x318] sm:$0xff] }
  0x3b   :  { %409 = vmatpush.msra.mxu0 %v356_v35  ;;  %468 = vmatpush.msra.mxu3 %v391_v38  ;;  %v367_v35 = vld [vmem:[#allocation2 + $0x308] sm:$0xff]  ;;  %v517_v37 = vld [vmem:[#allocation2 + $0x4d8] sm:$0xff]  ;;  %v552_v38 = vld [vmem:[#allocation2 + $0x5f0] sm:$0xff] }
  0x3c   :  { %449 = vmatpush.msra.mxu2 %v357_v36  ;;  %429 = vmatpush.msra.mxu1 %v388_v41  ;;  %v516_v36 = vld [vmem:[#allocation2 + $0x4d0] sm:$0xff]  ;;  %v515_v41 = vld [vmem:[#allocation2 + $0x4c8] sm:$0xff] }
  0x3d   :  { %410 = vmatpush.msra.mxu0 %v354_v39  ;;  %469 = vmatpush.msra.mxu3 %v389_v42  ;;  %v553_v39 = vld [vmem:[#allocation2 + $0x5f8] sm:$0xff]  ;;  %v550_v42 = vld [vmem:[#allocation2 + $0x5e0] sm:$0xff] }
  0x3e   :  { %450 = vmatpush.msra.mxu2 %v355_v40  ;;  %430 = vmatpush.msra.mxu1 %v386_v45  ;;  %v514_v40 = vld [vmem:[#allocation2 + $0x4c0] sm:$0xff]  ;;  %v513_v45 = vld [vmem:[#allocation2 + $0x4b8] sm:$0xff] }
  0x3f   :  { %411 = vmatpush.msra.mxu0 %v352_v43  ;;  %470 = vmatpush.msra.mxu3 %v387_v46  ;;  %v551_v43 = vld [vmem:[#allocation2 + $0x5e8] sm:$0xff]  ;;  %v548_v46 = vld [vmem:[#allocation2 + $0x5d0] sm:$0xff] }
  0x40   :  { %451 = vmatpush.msra.mxu2 %v353_v44  ;;  %431 = vmatpush.msra.mxu1 %v384_v49  ;;  %v512_v44 = vld [vmem:[#allocation2 + $0x4b0] sm:$0xff]  ;;  %v511_v49 = vld [vmem:[#allocation2 + $0x4a8] sm:$0xff] }
  0x41   :  { %412 = vmatpush.msra.mxu0 %v350_v47  ;;  %471 = vmatpush.msra.mxu3 %v385_v50  ;;  %v549_v47 = vld [vmem:[#allocation2 + $0x5d8] sm:$0xff]  ;;  %v546_v50 = vld [vmem:[#allocation2 + $0x5c0] sm:$0xff] }
  0x42   :  { %452 = vmatpush.msra.mxu2 %v351_v48  ;;  %432 = vmatpush.msra.mxu1 %v382_v53  ;;  %v510_v48 = vld [vmem:[#allocation2 + $0x4a0] sm:$0xff]  ;;  %v509_v53 = vld [vmem:[#allocation2 + $0x498] sm:$0xff] }
  0x43   :  { %413 = vmatpush.msra.mxu0 %v348_v51  ;;  %472 = vmatpush.msra.mxu3 %v383_v54  ;;  %v547_v51 = vld [vmem:[#allocation2 + $0x5c8] sm:$0xff]  ;;  %v506_v54 = vld [vmem:[#allocation2 + $0x480] sm:$0xff] }
  0x44   :  { %453 = vmatpush.msra.mxu2 %v349_v52  ;;  %433 = vmatpush.msra.mxu1 %v380_v57  ;;  %v508_v52 = vld [vmem:[#allocation2 + $0x490] sm:$0xff]  ;;  %v545_v57 = vld [vmem:[#allocation2 + $0x5b8] sm:$0xff] }
  0x45   :  { %414 = vmatpush.msra.mxu0 %v346_v55  ;;  %473 = vmatpush.msra.mxu3 %v381_v58  ;;  %v544_v55 = vld [vmem:[#allocation2 + $0x5b0] sm:$0xff] }
  0x46   :  { %454 = vmatpush.msra.mxu2 %v347_v56  ;;  %434 = vmatpush.msra.mxu1 %v378_v62  ;;  %v507_v56 = vld [vmem:[#allocation2 + $0x488] sm:$0xff]  ;;  %v504_v58 = vld [vmem:[#allocation2 + $0x470] sm:$0xff] }
  0x47   :  { %415 = vmatpush.msra.mxu0 %v344_v60  ;;  %474 = vmatpush.msra.mxu3 %v379_v63  ;;  %v542_v60 = vld [vmem:[#allocation2 + $0x5a0] sm:$0xff]  ;;  %v543_v62 = vld [vmem:[#allocation2 + $0x5a8] sm:$0xff] }
  0x48   :  { %455 = vmatpush.msra.mxu2 %v345_v61  ;;  %435 = vmatpush.msra.mxu1 %v376_v4  ;;  %v505_v61 = vld [vmem:[#allocation2 + $0x478] sm:$0xff]  ;;  %v502_v63 = vld [vmem:[#allocation2 + $0x460] sm:$0xff] }
  0x49   :  { %416 = vmatpush.msra.mxu0 %v342_v0  ;;  %475 = vmatpush.msra.mxu3 %v377_v5  ;;  %v540_v0 = vld [vmem:[#allocation2 + $0x590] sm:$0xff]  ;;  %v538_v4 = vld [vmem:[#allocation2 + $0x580] sm:$0xff]  ;;  %v501_v5 = vld [vmem:[#allocation2 + $0x458] sm:$0xff] }
  0x4a   :  { %456 = vmatpush.msra.mxu2 %v343_v1  ;;  %436 = vmatpush.msra.mxu1 %v374_v8  ;;  %v503_v1 = vld [vmem:[#allocation2 + $0x468] sm:$0xff]  ;;  %v536_v8 = vld [vmem:[#allocation2 + $0x570] sm:$0xff] }
  0x4b   :  { %417 = vmatpush.msra.mxu0 %v340_v6  ;;  %476 = vmatpush.msra.mxu3 %v375_v9  ;;  %v539_v6 = vld [vmem:[#allocation2 + $0x588] sm:$0xff] }
  0x4c   :  { %457 = vmatpush.msra.mxu2 %v341_v7  ;;  %437 = vmatpush.msra.mxu1 %v372_v16  ;;  %v498_v7 = vld [vmem:[#allocation2 + $0x440] sm:$0xff]  ;;  %v499_v9 = vld [vmem:[#allocation2 + $0x448] sm:$0xff]  ;;  %v532_v16 = vld [vmem:[#allocation2 + $0x550] sm:$0xff] }
  0x4d   :  { %418 = vmatpush.msra.mxu0 %v338_v12  ;;  %477 = vmatpush.msra.mxu3 %v373_v17  ;;  %v534_v12 = vld [vmem:[#allocation2 + $0x560] sm:$0xff]  ;;  %v495_v17 = vld [vmem:[#allocation2 + $0x428] sm:$0xff] }
  0x4e   :  { %458 = vmatpush.msra.mxu2 %v339_v13  ;;  %438 = vmatpush.msra.mxu1 %v370_v22  ;;  %v497_v13 = vld [vmem:[#allocation2 + $0x438] sm:$0xff]  ;;  %v531_v22 = vld [vmem:[#allocation2 + $0x548] sm:$0xff] }
  0x4f   :  { %419 = vmatpush.msra.mxu0 %v336_v18  ;;  %478 = vmatpush.msra.mxu3 %v371_v23  ;;  %v533_v18 = vld [vmem:[#allocation2 + $0x558] sm:$0xff]  ;;  %v490_v23 = vld [vmem:[#allocation2 + $0x400] sm:$0xff] }
  0x50   :  { %459 = vmatpush.msra.mxu2 %v337_v19  ;;  %439 = vmatpush.msra.mxu1 %v368_v30  ;;  %v492_v19 = vld [vmem:[#allocation2 + $0x410] sm:$0xff]  ;;  %v525_v30 = vld [vmem:[#allocation2 + $0x518] sm:$0xff] }
  0x51   :  { %420 = vmatpush.msra.mxu0 %v334_v26  ;;  %479 = vmatpush.msra.mxu3 %v369_v31  ;;  %v529_v26 = vld [vmem:[#allocation2 + $0x538] sm:$0xff]  ;;  %v522_v31 = vld [vmem:[#allocation2 + $0x500] sm:$0xff] }
  0x52   :  { %460 = vmatpush.msra.mxu2 %v335_v27  ;;  %440 = vmatpush.msra.mxu1 %v366_v34  ;;  %v526_v27 = vld [vmem:[#allocation2 + $0x520] sm:$0xff] }
  0x53   :  { %480 = vmatpush.msra.mxu3 %v367_v35 }
  0x8d   :  { %v108_v10 = vpop.f32.mrf.mxu0 }
  0x8e   :  { %v128_v11 = vpop.f32.mrf.mxu1  ;;  %v109_v14 = vadd.f32 %v108_v10, %v66_v2  ;;  %v541_v2 = vld [vmem:[#allocation2 + $0x598] sm:$0xff] }
  0x8f   :  { %v129_v15 = vadd.f32 %v128_v11, %v67_v3  ;;  %v500_v3 = vld [vmem:[#allocation2 + $0x450] sm:$0xff]  ;;  %v537_v10 = vld [vmem:[#allocation2 + $0x578] sm:$0xff] }
  0x90   :  { %v171_v20 = vmul.f32 0.01, %v109_v14  ;;  %v496_v11 = vld [vmem:[#allocation2 + $0x430] sm:$0xff] }
  0x91   :  { %v172_v21 = vmul.f32 0.01, %v129_v15 }
  0x92   :  { %v175_v24 = vmax.f32 %v109_v14, %v171_v20  ;;  %v535_v14 = vld [vmem:[#allocation2 + $0x568] sm:$0xff]  ;;  %v530_v20 = vld [vmem:[#allocation2 + $0x540] sm:$0xff] }
  0x93   :  { %v176_v25 = vmax.f32 %v129_v15, %v172_v21  ;;  %v494_v15 = vld [vmem:[#allocation2 + $0x420] sm:$0xff]  ;;  %v493_v21 = vld [vmem:[#allocation2 + $0x418] sm:$0xff] }
  0x94   :  { %265 = vmatmul.f32.vlgmr.msrb.gmra.mxu0 %v175_v24  ;;  %305 = vmatmul.f32.vlgmr.msrb.gmra.mxu2 %v175_v24  ;;  %v528_v24 = vld [vmem:[#allocation2 + $0x530] sm:$0xff] }
  0x95   :  { %285 = vmatmul.f32.vlgmr.msrb.gmra.mxu1 %v176_v25  ;;  %325 = vmatmul.f32.vlgmr.msrb.gmra.mxu3 %v176_v25  ;;  %v491_v25 = vld [vmem:[#allocation2 + $0x408] sm:$0xff] }
  0x96   :  { %561 = vmatpush.msrb.mxu0 %v520_v28  ;;  %601 = vmatpush.msrb.mxu2 %v521_v29  ;;  %v527_v28 = vld [vmem:[#allocation2 + $0x528] sm:$0xff]  ;;  %v524_v29 = vld [vmem:[#allocation2 + $0x510] sm:$0xff] }
  0x97   :  { %581 = vmatpush.msrb.mxu1 %v552_v38  ;;  %621 = vmatpush.msrb.mxu3 %v553_v39 }
  0x98   :  { %562 = vmatpush.msrb.mxu0 %v518_v32  ;;  %602 = vmatpush.msrb.mxu2 %v519_v33  ;;  %v523_v32 = vld [vmem:[#allocation2 + $0x508] sm:$0xff]  ;;  %v243_v33 = vld [vmem:[%s1417_s4] sm:$0x3] }
  0x99   :  { %582 = vmatpush.msrb.mxu1 %v550_v42  ;;  %622 = vmatpush.msrb.mxu3 %v551_v43  ;;  %v245_v34 = vperm.slane %v243_v33, 0  ;;  %v246_v42 = vperm.slane %v243_v33, 1  ;;  %v704_v33 = vld [vmem:[#allocation2 + $0x7d0] sm:$0xff] }
  0x9a   :  { %563 = vmatpush.msrb.mxu0 %v516_v36  ;;  %603 = vmatpush.msrb.mxu2 %v517_v37 }
  0x9b   :  { %583 = vmatpush.msrb.mxu1 %v548_v46  ;;  %623 = vmatpush.msrb.mxu3 %v549_v47  ;;  %v677_v47 = vld [vmem:[#allocation2 + $0x6f8] sm:$0xff] }
  0x9c   :  { %564 = vmatpush.msrb.mxu0 %v514_v40  ;;  %604 = vmatpush.msrb.mxu2 %v515_v41  ;;  %v68_v40 = vperm.slane %v1197_v59, 2 }
  0x9d   :  { %584 = vmatpush.msrb.mxu1 %v546_v50  ;;  %624 = vmatpush.msrb.mxu3 %v547_v51  ;;  %v675_v51 = vld [vmem:[#allocation2 + $0x6e8] sm:$0xff] }
  0x9e   :  { %565 = vmatpush.msrb.mxu0 %v512_v44  ;;  %605 = vmatpush.msrb.mxu2 %v513_v45 }
  0x9f   :  { %585 = vmatpush.msrb.mxu1 %v544_v55  ;;  %625 = vmatpush.msrb.mxu3 %v545_v57  ;;  %v672_v57 = vld [vmem:[#allocation2 + $0x6d0] sm:$0xff] }
  0xa0   :  { %566 = vmatpush.msrb.mxu0 %v510_v48  ;;  %606 = vmatpush.msrb.mxu2 %v511_v49  ;;  %v676_v48 = vld [vmem:[#allocation2 + $0x6f0] sm:$0xff] }
  0xa1   :  { %586 = vmatpush.msrb.mxu1 %v542_v60  ;;  %626 = vmatpush.msrb.mxu3 %v543_v62 }
  0xa2   :  { %567 = vmatpush.msrb.mxu0 %v508_v52  ;;  %607 = vmatpush.msrb.mxu2 %v509_v53  ;;  %v674_v52 = vld [vmem:[#allocation2 + $0x6e0] sm:$0xff]  ;;  %v69_v53 = vperm.slane %v1197_v59, 3  ;;  %v708_v59 = vld [vmem:[#allocation2 + $0x7f0] sm:$0xff] }
  0xa3   :  { %587 = vmatpush.msrb.mxu1 %v540_v0  ;;  %627 = vmatpush.msrb.mxu3 %v541_v2  ;;  %v709_v0 = vld [vmem:[#allocation2 + $0x7f8] sm:$0xff] }
  0xa4   :  { %568 = vmatpush.msrb.mxu0 %v506_v54  ;;  %608 = vmatpush.msrb.mxu2 %v507_v56  ;;  %v673_v56 = vld [vmem:[#allocation2 + $0x6d8] sm:$0xff] }
  0xa5   :  { %588 = vmatpush.msrb.mxu1 %v538_v4  ;;  %628 = vmatpush.msrb.mxu3 %v539_v6  ;;  %v669_v2 = vld [vmem:[#allocation2 + $0x6b8] sm:$0xff]  ;;  %v706_v6 = vld [vmem:[#allocation2 + $0x7e0] sm:$0xff] }
  0xa6   :  { %569 = vmatpush.msrb.mxu0 %v504_v58  ;;  %609 = vmatpush.msrb.mxu2 %v505_v61 }
  0xa7   :  { %589 = vmatpush.msrb.mxu1 %v536_v8  ;;  %629 = vmatpush.msrb.mxu3 %v537_v10  ;;  %v705_v8 = vld [vmem:[#allocation2 + $0x7d8] sm:$0xff] }
  0xa8   :  { %570 = vmatpush.msrb.mxu0 %v502_v63  ;;  %610 = vmatpush.msrb.mxu2 %v503_v1  ;;  %v671_v63 = vld [vmem:[#allocation2 + $0x6c8] sm:$0xff]  ;;  %v670_v1 = vld [vmem:[#allocation2 + $0x6c0] sm:$0xff]  ;;  %v665_v10 = vld [vmem:[#allocation2 + $0x698] sm:$0xff] }
  0xa9   :  { %590 = vmatpush.msrb.mxu1 %v534_v12  ;;  %630 = vmatpush.msrb.mxu3 %v535_v14  ;;  %v663_v12 = vld [vmem:[#allocation2 + $0x688] sm:$0xff]  ;;  %v661_v14 = vld [vmem:[#allocation2 + $0x678] sm:$0xff] }
  0xaa   :  { %571 = vmatpush.msrb.mxu0 %v500_v3  ;;  %611 = vmatpush.msrb.mxu2 %v501_v5  ;;  %v148_v35 = vpop.f32.mrf.mxu2  ;;  %v707_v3 = vld [vmem:[#allocation2 + $0x7e8] sm:$0xff]  ;;  %v668_v5 = vld [vmem:[#allocation2 + $0x6b0] sm:$0xff] }
  0xab   :  { %591 = vmatpush.msrb.mxu1 %v532_v16  ;;  %631 = vmatpush.msrb.mxu3 %v533_v18  ;;  %v149_v44 = vadd.f32 %v148_v35, %v68_v40  ;;  %v659_v16 = vld [vmem:[#allocation2 + $0x668] sm:$0xff]  ;;  %v657_v18 = vld [vmem:[#allocation2 + $0x658] sm:$0xff]  ;;  %v662_v40 = vld [vmem:[#allocation2 + $0x680] sm:$0xff] }
  0xac   :  { %572 = vmatpush.msrb.mxu0 %v498_v7  ;;  %612 = vmatpush.msrb.mxu2 %v499_v9  ;;  %v667_v7 = vld [vmem:[#allocation2 + $0x6a8] sm:$0xff]  ;;  %v681_v35 = vld [vmem:[#allocation2 + $0x718] sm:$0xff] }
  0xad   :  { %592 = vmatpush.msrb.mxu1 %v530_v20  ;;  %632 = vmatpush.msrb.mxu3 %v531_v22  ;;  %v168_v36 = vpop.f32.mrf.mxu3  ;;  %v173_v55 = vmul.f32 0.01, %v149_v44  ;;  %v655_v20 = vld [vmem:[#allocation2 + $0x648] sm:$0xff]  ;;  %v653_v22 = vld [vmem:[#allocation2 + $0x638] sm:$0xff] }
  0xae   :  { %573 = vmatpush.msrb.mxu0 %v496_v11  ;;  %613 = vmatpush.msrb.mxu2 %v497_v13  ;;  %v169_v60 = vadd.f32 %v168_v36, %v69_v53  ;;  %v703_v11 = vld [vmem:[#allocation2 + $0x7c8] sm:$0xff]  ;;  %v701_v13 = vld [vmem:[#allocation2 + $0x7b8] sm:$0xff]  ;;  %v664_v36 = vld [vmem:[#allocation2 + $0x690] sm:$0xff] }
  0xaf   :  { %593 = vmatpush.msrb.mxu1 %v528_v24  ;;  %633 = vmatpush.msrb.mxu3 %v529_v26  ;;  %v177_v62 = vmax.f32 %v149_v44, %v173_v55  ;;  %v651_v24 = vld [vmem:[#allocation2 + $0x628] sm:$0xff]  ;;  %v649_v26 = vld [vmem:[#allocation2 + $0x618] sm:$0xff]  ;;  %v660_v44 = vld [vmem:[#allocation2 + $0x670] sm:$0xff] }
  0xb0   :  { %574 = vmatpush.msrb.mxu0 %v494_v15  ;;  %614 = vmatpush.msrb.mxu2 %v495_v17  ;;  %v174_v4 = vmul.f32 0.01, %v169_v60  ;;  %v699_v15 = vld [vmem:[#allocation2 + $0x7a8] sm:$0xff]  ;;  %v697_v17 = vld [vmem:[#allocation2 + $0x798] sm:$0xff]  ;;  %v694_v53 = vld [vmem:[#allocation2 + $0x780] sm:$0xff] }
  0xb1   :  { %594 = vmatpush.msrb.mxu1 %v526_v27  ;;  %634 = vmatpush.msrb.mxu3 %v527_v28  ;;  %v687_v27 = vld [vmem:[#allocation2 + $0x748] sm:$0xff]  ;;  %v829_v55 = vld [vmem:[%s1418_s5 + $0xe0] sm:$0xff] }
  0xb2   :  { %575 = vmatpush.msrb.mxu0 %v492_v19  ;;  %615 = vmatpush.msrb.mxu2 %v493_v21  ;;  %v178_v9 = vmax.f32 %v169_v60, %v174_v4  ;;  %v695_v19 = vld [vmem:[#allocation2 + $0x788] sm:$0xff]  ;;  %v693_v21 = vld [vmem:[#allocation2 + $0x778] sm:$0xff]  ;;  %v648_v4 = vld [vmem:[#allocation2 + $0x610] sm:$0xff] }
  0xb3   :  { %595 = vmatpush.msrb.mxu1 %v524_v29  ;;  %635 = vmatpush.msrb.mxu3 %v525_v30  ;;  %v647_v28 = vld [vmem:[#allocation2 + $0x608] sm:$0xff]  ;;  %v685_v29 = vld [vmem:[#allocation2 + $0x738] sm:$0xff] }
  0xb4   :  { %576 = vmatpush.msrb.mxu0 %v490_v23  ;;  %616 = vmatpush.msrb.mxu2 %v491_v25  ;;  %v691_v23 = vld [vmem:[#allocation2 + $0x768] sm:$0xff]  ;;  %v689_v25 = vld [vmem:[#allocation2 + $0x758] sm:$0xff] }
  0xb5   :  { %596 = vmatpush.msrb.mxu1 %v522_v31  ;;  %636 = vmatpush.msrb.mxu3 %v523_v32  ;;  %v816_v30 = vld [vmem:[%s1418_s5 + $0x78] sm:$0xff]  ;;  %v683_v31 = vld [vmem:[#allocation2 + $0x728] sm:$0xff]  ;;  %v666_v32 = vld [vmem:[#allocation2 + $0x6a0] sm:$0xff] }
  0xb6   :  { %v828_v60 = vld [vmem:[%s1418_s5 + $0xd8] sm:$0xff] }
 0x111   :  { %v266_v37 = vpop.f32.mrf.mxu0 }
 0x112   :  { %v267_v38 = vadd.f32 %v266_v37, %v245_v34  ;;  %v286_v39 = vpop.f32.mrf.mxu1  ;;  %v815_v34 = vld [vmem:[%s1418_s5 + $0x70] sm:$0xff]  ;;  %v702_v37 = vld [vmem:[#allocation2 + $0x7c0] sm:$0xff] }
 0x114   :  { %v287_v41 = vadd.f32 %v286_v39, %v267_v38  ;;  %v814_v38 = vld [vmem:[%s1418_s5 + $0x68] sm:$0xff] }
 0x115   :  { %v679_v39 = vld [vmem:[#allocation2 + $0x708] sm:$0xff] }
 0x116   :  { %v329_v43 = vmul.f32 0.01, %v287_v41 }
 0x117   :  { %v306_v46 = vpop.f32.mrf.mxu2 }
 0x118   :  { %v331_v45 = vmax.f32 %v287_v41, %v329_v43  ;;  %v307_v49 = vadd.f32 %v306_v46, %v246_v42  ;;  %v326_v50 = vpop.f32.mrf.mxu3  ;;  %v700_v41 = vld [vmem:[#allocation2 + $0x7b0] sm:$0xff]  ;;  %v813_v42 = vld [vmem:[%s1418_s5 + $0x60] sm:$0xff]  ;;  %v832_v43 = vld [vmem:[%s1418_s5 + $0xf8] sm:$0xff] }
 0x119   :  { %v812_v46 = vld [vmem:[%s1418_s5 + $0x58] sm:$0xff] }
 0x11a   :  { %421 = vmatmul.f32.vlgmr.msra.gmra.mxu0 %v331_v45  ;;  %461 = vmatmul.f32.vlgmr.msra.gmra.mxu2 %v331_v45  ;;  %v327_v54 = vadd.f32 %v326_v50, %v307_v49  ;;  %v698_v45 = vld [vmem:[#allocation2 + $0x7a0] sm:$0xff]  ;;  %v696_v49 = vld [vmem:[#allocation2 + $0x790] sm:$0xff] }
 0x11b   :  { %757 = vmatpush.msra.mxu2 %v677_v47  ;;  %717 = vmatpush.msra.mxu0 %v676_v48  ;;  %v831_v47 = vld [vmem:[%s1418_s5 + $0xf0] sm:$0xff]  ;;  %v658_v48 = vld [vmem:[#allocation2 + $0x660] sm:$0xff] }
 0x11c   :  { %v330_v58 = vmul.f32 0.01, %v327_v54  ;;  %v811_v50 = vld [vmem:[%s1418_s5 + $0x50] sm:$0xff] }
 0x11d   :  { %758 = vmatpush.msra.mxu2 %v675_v51  ;;  %718 = vmatpush.msra.mxu0 %v674_v52  ;;  %v830_v51 = vld [vmem:[%s1418_s5 + $0xe8] sm:$0xff]  ;;  %v656_v52 = vld [vmem:[#allocation2 + $0x650] sm:$0xff] }
 0x11e   :  { %v332_v61 = vmax.f32 %v327_v54, %v330_v58  ;;  %v810_v54 = vld [vmem:[%s1418_s5 + $0x48] sm:$0xff]  ;;  %v809_v58 = vld [vmem:[%s1418_s5 + $0x40] sm:$0xff] }
 0x11f   :  { %759 = vmatpush.msra.mxu2 %v673_v56  ;;  %719 = vmatpush.msra.mxu0 %v672_v57  ;;  %v654_v56 = vld [vmem:[#allocation2 + $0x640] sm:$0xff]  ;;  %v692_v57 = vld [vmem:[#allocation2 + $0x770] sm:$0xff] }
 0x120   :  { %441 = vmatmul.f32.vlgmr.msra.gmra.mxu1 %v332_v61  ;;  %481 = vmatmul.f32.vlgmr.msra.gmra.mxu3 %v332_v61  ;;  %v652_v61 = vld [vmem:[#allocation2 + $0x630] sm:$0xff] }
 0x121   :  { %760 = vmatpush.msra.mxu2 %v671_v63  ;;  %777 = vmatpush.msra.mxu3 %v709_v0  ;;  %v808_v63 = vld [vmem:[%s1418_s5 + $0x38] sm:$0xff]  ;;  %v827_v0 = vld [vmem:[%s1418_s5 + $0xd0] sm:$0xff] }
 0x122   :  { %577 = vmatmul.f32.vlgmr.msrb.gmra.mxu0 %v177_v62  ;;  %617 = vmatmul.f32.vlgmr.msrb.gmra.mxu2 %v177_v62  ;;  %v690_v62 = vld [vmem:[#allocation2 + $0x760] sm:$0xff] }
 0x123   :  { %720 = vmatpush.msra.mxu0 %v670_v1  ;;  %737 = vmatpush.msra.mxu1 %v708_v59  ;;  %v650_v1 = vld [vmem:[#allocation2 + $0x620] sm:$0xff]  ;;  %v688_v59 = vld [vmem:[#allocation2 + $0x750] sm:$0xff] }
 0x124   :  { %761 = vmatpush.msra.mxu2 %v669_v2  ;;  %778 = vmatpush.msra.mxu3 %v707_v3  ;;  %v807_v2 = vld [vmem:[%s1418_s5 + $0x30] sm:$0xff]  ;;  %v826_v3 = vld [vmem:[%s1418_s5 + $0xc8] sm:$0xff] }
 0x125   :  { %721 = vmatpush.msra.mxu0 %v668_v5  ;;  %738 = vmatpush.msra.mxu1 %v706_v6  ;;  %v686_v5 = vld [vmem:[#allocation2 + $0x740] sm:$0xff]  ;;  %v806_v6 = vld [vmem:[%s1418_s5 + $0x28] sm:$0xff] }
 0x126   :  { %762 = vmatpush.msra.mxu2 %v667_v7  ;;  %779 = vmatpush.msra.mxu3 %v705_v8  ;;  %v825_v7 = vld [vmem:[%s1418_s5 + $0xc0] sm:$0xff] }
 0x127   :  { %722 = vmatpush.msra.mxu0 %v666_v32  ;;  %739 = vmatpush.msra.mxu1 %v704_v33  ;;  %v646_v8 = vld [vmem:[#allocation2 + $0x600] sm:$0xff] }
 0x128   :  { %597 = vmatmul.f32.vlgmr.msrb.gmra.mxu1 %v178_v9  ;;  %637 = vmatmul.f32.vlgmr.msrb.gmra.mxu3 %v178_v9  ;;  %v684_v9 = vld [vmem:[#allocation2 + $0x730] sm:$0xff] }
 0x129   :  { %763 = vmatpush.msra.mxu2 %v665_v10  ;;  %780 = vmatpush.msra.mxu3 %v703_v11  ;;  %v805_v10 = vld [vmem:[%s1418_s5 + $0x20] sm:$0xff]  ;;  %v824_v11 = vld [vmem:[%s1418_s5 + $0xb8] sm:$0xff] }
 0x12a   :  { %723 = vmatpush.msra.mxu0 %v664_v36  ;;  %740 = vmatpush.msra.mxu1 %v702_v37  ;;  %v993_v36 = vld [vmem:[%s1418_s5 + $0x160] sm:$0xff] }
 0x12b   :  { %764 = vmatpush.msra.mxu2 %v663_v12  ;;  %781 = vmatpush.msra.mxu3 %v701_v13  ;;  %v682_v12 = vld [vmem:[#allocation2 + $0x720] sm:$0xff]  ;;  %v804_v13 = vld [vmem:[%s1418_s5 + $0x18] sm:$0xff] }
 0x12c   :  { %724 = vmatpush.msra.mxu0 %v662_v40  ;;  %741 = vmatpush.msra.mxu1 %v700_v41  ;;  %v1009_v37 = vld [vmem:[%s1418_s5 + $0x1e0] sm:$0xff] }
 0x12d   :  { %765 = vmatpush.msra.mxu2 %v661_v14  ;;  %782 = vmatpush.msra.mxu3 %v699_v15  ;;  %v823_v14 = vld [vmem:[%s1418_s5 + $0xb0] sm:$0xff]  ;;  %v978_v40 = vld [vmem:[%s1417_s4 + $0x2] sm:$0x3] }
 0x12e   :  { %725 = vmatpush.msra.mxu0 %v660_v44  ;;  %742 = vmatpush.msra.mxu1 %v698_v45  ;;  %v680_v15 = vld [vmem:[#allocation2 + $0x710] sm:$0xff] }
 0x12f   :  { %766 = vmatpush.msra.mxu2 %v659_v16  ;;  %783 = vmatpush.msra.mxu3 %v697_v17  ;;  %v803_v16 = vld [vmem:[%s1418_s5 + $0x10] sm:$0xff]  ;;  %v822_v17 = vld [vmem:[%s1418_s5 + $0xa8] sm:$0xff] }
 0x130   :  { %726 = vmatpush.msra.mxu0 %v658_v48  ;;  %743 = vmatpush.msra.mxu1 %v696_v49  ;;  %v1007_v45 = vld [vmem:[%s1418_s5 + $0x1d0] sm:$0xff]  ;;  %v990_v48 = vld [vmem:[%s1418_s5 + $0x148] sm:$0xff] }
 0x131   :  { %767 = vmatpush.msra.mxu2 %v657_v18  ;;  %784 = vmatpush.msra.mxu3 %v695_v19  ;;  %v678_v18 = vld [vmem:[#allocation2 + $0x700] sm:$0xff]  ;;  %v802_v19 = vld [vmem:[%s1418_s5 + $0x8] sm:$0xff] }
 0x132   :  { %727 = vmatpush.msra.mxu0 %v656_v52  ;;  %744 = vmatpush.msra.mxu1 %v694_v53  ;;  %v989_v52 = vld [vmem:[%s1418_s5 + $0x140] sm:$0xff] }
 0x133   :  { %768 = vmatpush.msra.mxu2 %v655_v20  ;;  %785 = vmatpush.msra.mxu3 %v693_v21  ;;  %v821_v20 = vld [vmem:[%s1418_s5 + $0xa0] sm:$0xff] }
 0x134   :  { %728 = vmatpush.msra.mxu0 %v654_v56  ;;  %745 = vmatpush.msra.mxu1 %v692_v57  ;;  %v801_v21 = vld [vmem:[%s1418_s5] sm:$0xff]  ;;  %v988_v56 = vld [vmem:[%s1418_s5 + $0x138] sm:$0xff] }
 0x135   :  { %769 = vmatpush.msra.mxu2 %v653_v22  ;;  %786 = vmatpush.msra.mxu3 %v691_v23  ;;  %v820_v22 = vld [vmem:[%s1418_s5 + $0x98] sm:$0xff]  ;;  %v819_v23 = vld [vmem:[%s1418_s5 + $0x90] sm:$0xff] }
 0x136   :  { %729 = vmatpush.msra.mxu0 %v652_v61  ;;  %746 = vmatpush.msra.mxu1 %v690_v62 }
 0x137   :  { %770 = vmatpush.msra.mxu2 %v651_v24  ;;  %787 = vmatpush.msra.mxu3 %v689_v25  ;;  %v818_v24 = vld [vmem:[%s1418_s5 + $0x88] sm:$0xff] }
 0x138   :  { %730 = vmatpush.msra.mxu0 %v650_v1  ;;  %747 = vmatpush.msra.mxu1 %v688_v59 }
 0x139   :  { %771 = vmatpush.msra.mxu2 %v649_v26  ;;  %788 = vmatpush.msra.mxu3 %v687_v27  ;;  %v817_v26 = vld [vmem:[%s1418_s5 + $0x80] sm:$0xff]  ;;  %v996_v27 = vld [vmem:[%s1418_s5 + $0x178] sm:$0xff] }
 0x13a   :  { %731 = vmatpush.msra.mxu0 %v648_v4  ;;  %748 = vmatpush.msra.mxu1 %v686_v5 }
 0x13b   :  { %772 = vmatpush.msra.mxu2 %v647_v28  ;;  %789 = vmatpush.msra.mxu3 %v685_v29  ;;  %v995_v28 = vld [vmem:[%s1418_s5 + $0x170] sm:$0xff]  ;;  %v1012_v29 = vld [vmem:[%s1418_s5 + $0x1f8] sm:$0xff] }
 0x13c   :  { %732 = vmatpush.msra.mxu0 %v646_v8  ;;  %749 = vmatpush.msra.mxu1 %v684_v9  ;;  %v1006_v8 = vld [vmem:[%s1418_s5 + $0x1c8] sm:$0xff] }
 0x13d   :  { %906 = vmatpush.msrb.mxu2 %v816_v30  ;;  %790 = vmatpush.msra.mxu3 %v683_v31  ;;  %v994_v30 = vld [vmem:[%s1418_s5 + $0x168] sm:$0xff]  ;;  %v1011_v31 = vld [vmem:[%s1418_s5 + $0x1f0] sm:$0xff] }
 0x13e   :  { %750 = vmatpush.msra.mxu1 %v682_v12  ;;  %866 = vmatpush.msrb.mxu0 %v996_v27  ;;  %v986_v9 = vld [vmem:[%s1418_s5 + $0x128] sm:$0xff]  ;;  %v1004_v12 = vld [vmem:[%s1418_s5 + $0x1b8] sm:$0xff] }
 0x13f   :  { %907 = vmatpush.msrb.mxu2 %v815_v34  ;;  %791 = vmatpush.msra.mxu3 %v681_v35  ;;  %v979_v34 = vld [vmem:[%s1417_s4 + $0x4] sm:$0x3]  ;;  %v1010_v35 = vld [vmem:[%s1418_s5 + $0x1e8] sm:$0xff] }
 0x140   :  { %751 = vmatpush.msra.mxu1 %v680_v15  ;;  %867 = vmatpush.msrb.mxu0 %v995_v28  ;;  %v983_v15 = vld [vmem:[%s1418_s5 + $0x110] sm:$0xff] }
 0x141   :  { %908 = vmatpush.msrb.mxu2 %v814_v38  ;;  %792 = vmatpush.msra.mxu3 %v679_v39  ;;  %v557_v38 = vperm.slane %v979_v34, 0  ;;  %v992_v39 = vld [vmem:[%s1418_s5 + $0x158] sm:$0xff] }
 0x142   :  { %752 = vmatpush.msra.mxu1 %v678_v18  ;;  %868 = vmatpush.msrb.mxu0 %v994_v30  ;;  %v1001_v18 = vld [vmem:[%s1418_s5 + $0x1a0] sm:$0xff] }
 0x143   :  { %909 = vmatpush.msrb.mxu2 %v813_v42  ;;  %926 = vmatpush.msrb.mxu3 %v832_v43  ;;  %v1008_v42 = vld [vmem:[%s1418_s5 + $0x1d8] sm:$0xff]  ;;  %v991_v43 = vld [vmem:[%s1418_s5 + $0x150] sm:$0xff] }
 0x144   :  { %886 = vmatpush.msrb.mxu1 %v1012_v29  ;;  %869 = vmatpush.msrb.mxu0 %v993_v36 }
 0x145   :  { %910 = vmatpush.msrb.mxu2 %v812_v46  ;;  %927 = vmatpush.msrb.mxu3 %v831_v47  ;;  %v401_v46 = vperm.slane %v978_v40, 0 }
 0x146   :  { %887 = vmatpush.msrb.mxu1 %v1011_v31  ;;  %870 = vmatpush.msrb.mxu0 %v992_v39 }
 0x147   :  { %911 = vmatpush.msrb.mxu2 %v811_v50  ;;  %928 = vmatpush.msrb.mxu3 %v830_v51  ;;  %v558_v51 = vperm.slane %v979_v34, 1 }
 0x148   :  { %888 = vmatpush.msrb.mxu1 %v1010_v35  ;;  %871 = vmatpush.msrb.mxu0 %v991_v43 }
 0x149   :  { %912 = vmatpush.msrb.mxu2 %v810_v54  ;;  %929 = vmatpush.msrb.mxu3 %v829_v55 }
 0x14a   :  { %889 = vmatpush.msrb.mxu1 %v1009_v37  ;;  %872 = vmatpush.msrb.mxu0 %v990_v48 }
 0x14b   :  { %913 = vmatpush.msrb.mxu2 %v809_v58  ;;  %930 = vmatpush.msrb.mxu3 %v828_v60  ;;  %v402_v58 = vperm.slane %v978_v40, 1 }
 0x14c   :  { %890 = vmatpush.msrb.mxu1 %v1008_v42  ;;  %873 = vmatpush.msrb.mxu0 %v989_v52 }
 0x14d   :  { %914 = vmatpush.msrb.mxu2 %v808_v63  ;;  %931 = vmatpush.msrb.mxu3 %v827_v0 }
 0x14e   :  { %891 = vmatpush.msrb.mxu1 %v1007_v45  ;;  %874 = vmatpush.msrb.mxu0 %v988_v56 }
 0x14f   :  { %915 = vmatpush.msrb.mxu2 %v807_v2  ;;  %932 = vmatpush.msrb.mxu3 %v826_v3 }
 0x150   :  { %892 = vmatpush.msrb.mxu1 %v1006_v8 }
 0x151   :  { %916 = vmatpush.msrb.mxu2 %v806_v6  ;;  %933 = vmatpush.msrb.mxu3 %v825_v7  ;;  %v987_v7 = vld [vmem:[%s1418_s5 + $0x130] sm:$0xff] }
 0x152   :  { %875 = vmatpush.msrb.mxu0 %v987_v7 }
 0x153   :  { %917 = vmatpush.msrb.mxu2 %v805_v10  ;;  %934 = vmatpush.msrb.mxu3 %v824_v11  ;;  %v1005_v10 = vld [vmem:[%s1418_s5 + $0x1c0] sm:$0xff] }
 0x154   :  { %v985_v11 = vld [vmem:[%s1418_s5 + $0x120] sm:$0xff]  ;;  %876 = vmatpush.msrb.mxu0 %v986_v9  ;;  %893 = vmatpush.msrb.mxu1 %v1005_v10 }
 0x155   :  { %918 = vmatpush.msrb.mxu2 %v804_v13  ;;  %935 = vmatpush.msrb.mxu3 %v823_v14  ;;  %v984_v13 = vld [vmem:[%s1418_s5 + $0x118] sm:$0xff]  ;;  %v1003_v14 = vld [vmem:[%s1418_s5 + $0x1b0] sm:$0xff] }
 0x156   :  { %877 = vmatpush.msrb.mxu0 %v985_v11  ;;  %894 = vmatpush.msrb.mxu1 %v1004_v12 }
 0x157   :  { %919 = vmatpush.msrb.mxu2 %v803_v16  ;;  %936 = vmatpush.msrb.mxu3 %v822_v17  ;;  %v1002_v16 = vld [vmem:[%s1418_s5 + $0x1a8] sm:$0xff] }
 0x158   :  { %878 = vmatpush.msrb.mxu0 %v984_v13  ;;  %895 = vmatpush.msrb.mxu1 %v1003_v14  ;;  %v982_v17 = vld [vmem:[%s1418_s5 + $0x108] sm:$0xff] }
 0x159   :  { %920 = vmatpush.msrb.mxu2 %v802_v19  ;;  %937 = vmatpush.msrb.mxu3 %v821_v20  ;;  %v981_v19 = vld [vmem:[%s1418_s5 + $0x100] sm:$0xff]  ;;  %v1000_v20 = vld [vmem:[%s1418_s5 + $0x198] sm:$0xff] }
 0x15a   :  { %879 = vmatpush.msrb.mxu0 %v983_v15  ;;  %896 = vmatpush.msrb.mxu1 %v1002_v16 }
 0x15b   :  { %921 = vmatpush.msrb.mxu2 %v801_v21  ;;  %938 = vmatpush.msrb.mxu3 %v820_v22  ;;  %v999_v21 = vld [vmem:[%s1418_s5 + $0x190] sm:$0xff]  ;;  %v998_v22 = vld [vmem:[%s1418_s5 + $0x188] sm:$0xff] }
 0x15c   :  { %880 = vmatpush.msrb.mxu0 %v982_v17  ;;  %897 = vmatpush.msrb.mxu1 %v1001_v18 }
 0x15d   :  { %939 = vmatpush.msrb.mxu3 %v819_v23  ;;  %v997_v23 = vld [vmem:[%s1418_s5 + $0x180] sm:$0xff] }
 0x15e   :  { %881 = vmatpush.msrb.mxu0 %v981_v19  ;;  %898 = vmatpush.msrb.mxu1 %v1000_v20 }
 0x15f   :  { %940 = vmatpush.msrb.mxu3 %v818_v24  ;;  %v980_v24 = vld [vmem:[%s1417_s4 + $0x6] sm:$0x3] }
 0x160   :  { %899 = vmatpush.msrb.mxu1 %v999_v21  ;;  %v714_v30 = vperm.slane %v980_v24, 1 }
 0x161   :  { %941 = vmatpush.msrb.mxu3 %v817_v26 }
 0x162   :  { %900 = vmatpush.msrb.mxu1 %v998_v22 }
 0x164   :  { %901 = vmatpush.msrb.mxu1 %v997_v23 }
 0x197   :  { %v422_v25 = vpop.f32.mrf.mxu0 }
 0x198   :  { %v423_v54 = vadd.f32 %v422_v25, %v401_v46  ;;  %v713_v25 = vperm.slane %v980_v24, 0 }
 0x19d   :  { %v442_v32 = vpop.f32.mrf.mxu1  ;;  %v462_v33 = vpop.f32.mrf.mxu2 }
 0x19e   :  { %v443_v57 = vadd.f32 %v442_v32, %v423_v54  ;;  %v463_v1 = vadd.f32 %v462_v33, %v402_v58 }
 0x19f   :  { %v578_v41 = vpop.f32.mrf.mxu0 }
 0x1a0   :  { %v579_v47 = vadd.f32 %v578_v41, %v557_v38  ;;  %v485_v0 = vmul.f32 0.01, %v443_v57 }
 0x1a2   :  { %v487_v4 = vmax.f32 %v443_v57, %v485_v0 }
 0x1a3   :  { %v482_v44 = vpop.f32.mrf.mxu3 }
 0x1a4   :  { %v483_v2 = vadd.f32 %v482_v44, %v463_v1  ;;  %v1017_v44 = vld [vmem:[%s1419_s6] ss:$0 sm:$0xff] }
 0x1a5   :  { %v598_v49 = vpop.f32.mrf.mxu1  ;;  %v618_v53 = vpop.f32.mrf.mxu2 }
 0x1a6   :  { %v599_v50 = vadd.f32 %v598_v49, %v579_v47  ;;  %v619_v61 = vadd.f32 %v618_v53, %v558_v51  ;;  %v486_v5 = vmul.f32 0.01, %v483_v2 }
 0x1a8   :  { %v641_v55 = vmul.f32 0.01, %v599_v50  ;;  %v488_v6 = vmax.f32 %v483_v2, %v486_v5 }
 0x1aa   :  { %v643_v60 = vmax.f32 %v599_v50, %v641_v55 }
 0x1ab   :  { %v638_v62 = vpop.f32.mrf.mxu3 }
 0x1ac   :  { %v639_v63 = vadd.f32 %v638_v62, %v619_v61  ;;  %733 = vmatmul.f32.vlgmr.msra.gmra.mxu0 %v643_v60  ;;  %773 = vmatmul.f32.vlgmr.msra.gmra.mxu2 %v643_v60 }
 0x1ae   :  { %v642_v59 = vmul.f32 0.01, %v639_v63 }
 0x1b0   :  { %v644_v3 = vmax.f32 %v639_v63, %v642_v59 }
 0x1b2   :  { %753 = vmatmul.f32.vlgmr.msra.gmra.mxu1 %v644_v3  ;;  %793 = vmatmul.f32.vlgmr.msra.gmra.mxu3 %v644_v3 }
 0x1b4   :  { %922 = vmatmul.f32.vlgmr.msrb.gmra.mxu2 %v487_v4 }
 0x1ba   :  { %942 = vmatmul.f32.vlgmr.msrb.gmra.mxu3 %v488_v6 }
 0x229   :  { %v734_v26 = vpop.f32.mrf.mxu0 }
 0x22a   :  { %v735_v27 = vadd.f32 %v734_v26, %v713_v25 }
 0x22f   :  { %v754_v28 = vpop.f32.mrf.mxu1  ;;  %v774_v31 = vpop.f32.mrf.mxu2 }
 0x230   :  { %v755_v29 = vadd.f32 %v754_v28, %v735_v27  ;;  %v775_v34 = vadd.f32 %v774_v31, %v714_v30 }
 0x232   :  { %v797_v32 = vmul.f32 0.01, %v755_v29 }
 0x234   :  { %v799_v33 = vmax.f32 %v755_v29, %v797_v32 }
 0x235   :  { %v794_v35 = vpop.f32.mrf.mxu3 }
 0x236   :  { %v795_v36 = vadd.f32 %v794_v35, %v775_v34  ;;  %882 = vmatmul.f32.vlgmr.msrb.gmra.mxu0 %v799_v33 }
 0x237   :  { %v923_v42 = vpop.f32.mrf.mxu2 }
 0x238   :  { %v798_v37 = vmul.f32 0.01, %v795_v36 }
 0x23a   :  { %v800_v38 = vmax.f32 %v795_v36, %v798_v37 }
 0x23c   :  { %902 = vmatmul.f32.vlgmr.msrb.gmra.mxu1 %v800_v38 }
 0x23d   :  { %v943_v45 = vpop.f32.mrf.mxu3 }
 0x2b3   :  { %v883_v39 = vpop.f32.mrf.mxu0 }
 0x2b9   :  { %v903_v40 = vpop.f32.mrf.mxu1 }
 0x2ba   :  { %v904_v41 = vadd.f32 %v903_v40, %v883_v39 }
 0x2bc   :  { %v924_v43 = vadd.f32 %v923_v42, %v904_v41 }
 0x2be   :  { %v944_v46 = vadd.f32 %v943_v45, %v924_v43 }
 0x2c0   :  { %v950_v47 = vadd.f32 %v1017_v44, %v944_v46 }
 0x2c2   :  { %952 = vst.msk [vmem:[#allocation5] sm:$0xf] %vm951_vm2, %v950_v47 }
 0x2c3   :  { %963 = dma.vmem_to_hbm [thread:$0]  %s959_s26, 64, %s961_s29, [#allocation4]  }
 0x2c4   :  { %1068 = dma.done.wait [#allocation4], 64  }
 0x2c5   :  { %1069 = vsyncadd [#allocation4], 4294967232 }
 0x2c6   :  { %968 = vsyncpa [#allocation3], 1 }
 0x2c7   :  { %969 = vsyncpa [#allocation4], 1 }

</bundles_post_ra>
